<compile_context>
chip_gen: v7x
topology: tpu7x:2x2x1
jax: 0.10.0
libtpu: 0.0.40
codegen_flags: <defaults>
</compile_context>

<pallas_src>
import functools

import jax
import jax.numpy as jnp
from jax import lax
from jax.experimental import pallas as pl
from jax.experimental.pallas import tpu as pltpu


def _round_up(x, m):
    return ((x + m - 1) // m) * m


def bernoulli_head_kernel(num_outputs, x_ref, wt_ref, b_ref, a_ref,
                          logits_ref, probs_ref, mode_ref, red_ref):
    # Linear layer: logits = x @ W^T + b  (MXU matmul, f32 accumulate).
    logits = jnp.dot(x_ref[...], wt_ref[...], preferred_element_type=jnp.float32)
    logits = logits + b_ref[...]

    # One exp + one log1p per element (instead of 3 exp + 2 log1p):
    #   e       = exp(-|logits|)
    #   sp_neg  = softplus(-logits) = -log(probs)
    #   softplus(logits) = sp_neg + logits           (identity, not recomputed)
    #   probs   = sigmoid(logits), sign-split stable form.
    e = jnp.exp(-jnp.abs(logits))
    sp_neg = jnp.maximum(-logits, 0.0) + jnp.log1p(e)
    r = 1.0 / (1.0 + e)
    probs = jnp.where(logits >= 0.0, r, e * r)

    a = a_ref[...].astype(jnp.float32)

    # entropy per element:  p*sp_neg + (1-p)*sp_pos = sp_neg + (1-p)*logits
    ent_elem = sp_neg + (1.0 - probs) * logits
    # log_prob per element: -(a*sp_neg + (1-a)*sp_pos) = -(sp_neg + (1-a)*logits)
    lp_elem = -(sp_neg + (1.0 - a) * logits)

    n_pad = logits.shape[-1]
    if num_outputs < n_pad:
        # Mask the zero-padded output columns out of the axis=-1 reductions.
        valid = lax.broadcasted_iota(jnp.int32, logits.shape, 1) < num_outputs
        zero = jnp.zeros_like(logits)
        ent_elem = jnp.where(valid, ent_elem, zero)
        lp_elem = jnp.where(valid, lp_elem, zero)

    ent = jnp.sum(ent_elem, axis=-1, keepdims=True)
    lp = jnp.sum(lp_elem, axis=-1, keepdims=True)

    logits_ref[...] = logits
    probs_ref[...] = probs
    # torch.gt(probs, 0.5).float()  ==  logits > 0 (sigmoid is monotone, sig(0)=0.5)
    mode_ref[...] = (logits > 0.0).astype(jnp.float32)
    # Pack the two (TB, 1) reductions into one (TB, 2) output.
    red_ref[:, 0:1] = ent
    red_ref[:, 1:2] = lp


class BernoulliDist:
    """Lightweight container mirroring FixedBernoulli's queried quantities."""

    def __init__(self, logits, probs, mode, entropy, log_probs):
        self.logits = logits
        self.probs = probs
        self._mode = mode
        self._entropy = entropy
        self._log_probs = log_probs

    def mode(self):
        return self._mode

    def entropy(self):
        return self._entropy          # shape (B,)

    def log_probs(self):
        return self._log_probs        # shape (B, 1)


def bernoulli_forward(x, weight, bias, actions, *, tb=512):
    """x: (B, num_inputs); weight: (num_outputs, num_inputs); bias: (num_outputs,);
    actions: (B, num_outputs) of 0/1 values (any float/bool dtype)."""
    B, num_inputs = x.shape
    num_outputs = weight.shape[0]

    # Lane-dense padded output width; batch tile (multiple of 8 sublanes).
    n_pad = _round_up(num_outputs, 128)
    TB = _round_up(min(tb, max(B, 8)), 8)
    B_pad = _round_up(B, TB)
    nb = B_pad // TB

    dt = x.dtype  # pass bf16 x for the bf16 MXU path; accumulation is f32 either way
    wt = jnp.zeros((num_inputs, n_pad), dt).at[:, :num_outputs].set(
        weight.T.astype(dt))
    b2 = jnp.zeros((1, n_pad), jnp.float32).at[:, :num_outputs].set(
        bias.astype(jnp.float32))
    x_p = x if B_pad == B else jnp.pad(x, ((0, B_pad - B), (0, 0)))
    a_p = jnp.zeros((B_pad, n_pad), jnp.float32).at[:B, :num_outputs].set(
        actions.astype(jnp.float32))

    kernel = functools.partial(bernoulli_head_kernel, num_outputs)

    tiled = lambda shape: pl.BlockSpec(shape, lambda i: (i, 0))
    resident = lambda shape: pl.BlockSpec(shape, lambda i: (0, 0))

    out_shapes = (
        jax.ShapeDtypeStruct((B_pad, n_pad), jnp.float32),  # logits
        jax.ShapeDtypeStruct((B_pad, n_pad), jnp.float32),  # probs
        jax.ShapeDtypeStruct((B_pad, n_pad), jnp.float32),  # mode
        jax.ShapeDtypeStruct((B_pad, 2), jnp.float32),      # [entropy, log_probs]
    )

    logits_p, probs_p, mode_p, red_p = pl.pallas_call(
        kernel,
        out_shape=out_shapes,
        grid=(nb,),
        in_specs=[
            tiled((TB, num_inputs)),          # x block
            resident((num_inputs, n_pad)),    # W^T, VMEM-resident across steps
            resident((1, n_pad)),             # bias, VMEM-resident
            tiled((TB, n_pad)),               # actions block
        ],
        out_specs=(
            tiled((TB, n_pad)),
            tiled((TB, n_pad)),
            tiled((TB, n_pad)),
            tiled((TB, 2)),
        ),
        compiler_params=pltpu.CompilerParams(
            dimension_semantics=("parallel",),   # megacore-shard the batch axis
            vmem_limit_bytes=32 * 1024 * 1024,   # safe on v5e/v6e/v7x for TB<=512
        ),
    )(x_p, wt, b2, a_p)

    logits = logits_p[:B, :num_outputs]
    probs = probs_p[:B, :num_outputs]
    mode = mode_p[:B, :num_outputs]
    entropy = red_p[:B, 0]
    log_probs = red_p[:B, 1:2]
    return BernoulliDist(logits, probs, mode, entropy, log_probs)


if __name__ == "__main__":
    key = jax.random.PRNGKey(0)
    k_x, k_w, k_a = jax.random.split(key, 3)

    B, num_inputs, num_outputs = 4, 32, 8

    # Deterministic params: orthogonal weight, zero bias (matches init_ in module).
    weight = jax.nn.initializers.orthogonal()(k_w, (num_outputs, num_inputs),
                                              jnp.float32)
    bias = jnp.zeros((num_outputs,), jnp.float32)

    x = jax.random.normal(k_x, (B, num_inputs), jnp.float32)
    actions = jax.random.bernoulli(k_a, 0.5, (B, num_outputs)).astype(jnp.float32)

    dist = bernoulli_forward(x, weight, bias, actions)
    jax.block_until_ready((dist.logits, dist.probs, dist.mode(),
                           dist.entropy(), dist.log_probs()))

    # Pure-JAX reference check
    logits_ref = x @ weight.T + bias
    probs_ref = jax.nn.sigmoid(logits_ref)
    ent_ref = jnp.sum(probs_ref * jax.nn.softplus(-logits_ref)
                      + (1 - probs_ref) * jax.nn.softplus(logits_ref), axis=-1)
    lp_ref = jnp.sum(-(actions * jax.nn.softplus(-logits_ref)
                       + (1 - actions) * jax.nn.softplus(logits_ref)),
                     axis=-1, keepdims=True)

    assert dist.logits.shape == (B, num_outputs)
    assert dist.entropy().shape == (B,)
    assert dist.log_probs().shape == (B, 1)
    assert jnp.allclose(dist.logits, logits_ref, atol=2e-5)
    assert jnp.allclose(dist.probs, probs_ref, atol=2e-5)
    assert jnp.allclose(dist.mode(), (probs_ref > 0.5).astype(jnp.float32))
    assert jnp.allclose(dist.entropy(), ent_ref, atol=2e-5)
    assert jnp.allclose(dist.log_probs(), lp_ref, atol=2e-5)

    print("KERNEL_OK")
</pallas_src>

<mosaic_0001>
module attributes {stable_mosaic.version = 11 : i64} {
  func.func @bernoulli_head_kernel(%arg0: i32, %arg1: memref<8x32xf32, #tpu.memory_space<vmem>>, %arg2: memref<32x128xf32, #tpu.memory_space<vmem>>, %arg3: memref<1x128xf32, #tpu.memory_space<vmem>>, %arg4: memref<8x128xf32, #tpu.memory_space<vmem>>, %arg5: memref<8x128xf32, #tpu.memory_space<vmem>>, %arg6: memref<8x128xf32, #tpu.memory_space<vmem>>, %arg7: memref<8x128xf32, #tpu.memory_space<vmem>>, %arg8: memref<8x2xf32, #tpu.memory_space<vmem>>) attributes {dimension_semantics = [#tpu.dimension_semantics<parallel>], iteration_bounds = array<i64: 1>, scalar_prefetch = 0 : i64, scratch_operands = 0 : i64, tpu.core_type = #tpu.core_type<tc>, window_params = [{transform_indices = @transform_0, window_bounds = array<i64: 8, 32>}, {pipeline_mode = #tpu.pipeline_mode<synchronous>, transform_indices = @transform_1, window_bounds = array<i64: 32, 128>}, {pipeline_mode = #tpu.pipeline_mode<synchronous>, transform_indices = @transform_2, window_bounds = array<i64: 1, 128>}, {transform_indices = @transform_3, window_bounds = array<i64: 8, 128>}, {transform_indices = @transform_4, window_bounds = array<i64: 8, 128>}, {transform_indices = @transform_5, window_bounds = array<i64: 8, 128>}, {transform_indices = @transform_6, window_bounds = array<i64: 8, 128>}, {transform_indices = @transform_7, window_bounds = array<i64: 8, 2>}]} {
    %c0 = arith.constant 0 : index
    %c0_0 = arith.constant 0 : index
    %0 = vector.load %arg1[%c0, %c0_0] : memref<8x32xf32, #tpu.memory_space<vmem>>, vector<8x32xf32>
    %c0_1 = arith.constant 0 : index
    %c0_2 = arith.constant 0 : index
    %1 = vector.load %arg2[%c0_1, %c0_2] : memref<32x128xf32, #tpu.memory_space<vmem>>, vector<32x128xf32>
    %cst = arith.constant dense<0.000000e+00> : vector<8x128xf32>
    %2 = tpu.matmul %0, %1, %cst {dimension_numbers = #tpu.dot_dimension_numbers<[1], [0], [0], [1], [0, 0, 1, 1], [], []>} : vector<8x32xf32>, vector<32x128xf32>, vector<8x128xf32> -> vector<8x128xf32>
    %c0_3 = arith.constant 0 : index
    %c0_4 = arith.constant 0 : index
    %3 = vector.load %arg3[%c0_3, %c0_4] : memref<1x128xf32, #tpu.memory_space<vmem>>, vector<1x128xf32>
    %4 = vector.broadcast %3 : vector<1x128xf32> to vector<8x128xf32>
    %5 = arith.addf %2, %4 : vector<8x128xf32>
    %6 = math.absf %5 : vector<8x128xf32>
    %cst_5 = arith.constant 0.000000e+00 : f32
    %7 = vector.broadcast %cst_5 : f32 to vector<8x128xf32>
    %8 = arith.subf %7, %6 : vector<8x128xf32>
    %9 = math.exp %8 : vector<8x128xf32>
    %cst_6 = arith.constant 0.000000e+00 : f32
    %10 = vector.broadcast %cst_6 : f32 to vector<8x128xf32>
    %11 = arith.subf %10, %5 : vector<8x128xf32>
    %cst_7 = arith.constant 0.000000e+00 : f32
    %12 = vector.broadcast %cst_7 : f32 to vector<8x128xf32>
    %13 = arith.maximumf %11, %12 : vector<8x128xf32>
    %14 = math.log1p %9 : vector<8x128xf32>
    %15 = arith.addf %13, %14 : vector<8x128xf32>
    %cst_8 = arith.constant 1.000000e+00 : f32
    %16 = vector.broadcast %cst_8 : f32 to vector<8x128xf32>
    %17 = arith.addf %16, %9 : vector<8x128xf32>
    %cst_9 = arith.constant 1.000000e+00 : f32
    %18 = vector.broadcast %cst_9 : f32 to vector<8x128xf32>
    %19 = arith.divf %18, %17 : vector<8x128xf32>
    %cst_10 = arith.constant 0.000000e+00 : f32
    %20 = vector.broadcast %cst_10 : f32 to vector<8x128xf32>
    %21 = arith.cmpf oge, %5, %20 : vector<8x128xf32>
    %22 = arith.mulf %9, %19 : vector<8x128xf32>
    %23 = arith.select %21, %19, %22 : vector<8x128xi1>, vector<8x128xf32>
    %c0_11 = arith.constant 0 : index
    %c0_12 = arith.constant 0 : index
    %24 = vector.load %arg4[%c0_11, %c0_12] : memref<8x128xf32, #tpu.memory_space<vmem>>, vector<8x128xf32>
    %cst_13 = arith.constant 1.000000e+00 : f32
    %25 = vector.broadcast %cst_13 : f32 to vector<8x128xf32>
    %26 = arith.subf %25, %23 : vector<8x128xf32>
    %27 = arith.mulf %26, %5 : vector<8x128xf32>
    %28 = arith.addf %15, %27 : vector<8x128xf32>
    %cst_14 = arith.constant 1.000000e+00 : f32
    %29 = vector.broadcast %cst_14 : f32 to vector<8x128xf32>
    %30 = arith.subf %29, %24 : vector<8x128xf32>
    %31 = arith.mulf %30, %5 : vector<8x128xf32>
    %32 = arith.addf %15, %31 : vector<8x128xf32>
    %cst_15 = arith.constant 0.000000e+00 : f32
    %33 = vector.broadcast %cst_15 : f32 to vector<8x128xf32>
    %34 = arith.subf %33, %32 : vector<8x128xf32>
    %35 = tpu.iota {dimensions = array<i32: 1>} : vector<8x128xi32>
    %c8_i32 = arith.constant 8 : i32
    %36 = vector.broadcast %c8_i32 : i32 to vector<8x128xi32>
    %37 = arith.cmpi slt, %35, %36 : vector<8x128xi32>
    %cst_16 = arith.constant 0.000000e+00 : f32
    %38 = vector.broadcast %cst_16 : f32 to vector<8x128xf32>
    %39 = arith.select %37, %28, %38 : vector<8x128xi1>, vector<8x128xf32>
    %40 = arith.select %37, %34, %38 : vector<8x128xi1>, vector<8x128xf32>
    %cst_17 = arith.constant dense<0.000000e+00> : vector<8xf32>
    %41 = vector.multi_reduction <add>, %39, %cst_17 [1] : vector<8x128xf32> to vector<8xf32>
    %42 = vector.shape_cast %41 : vector<8xf32> to vector<8x1xf32>
    %cst_18 = arith.constant dense<0.000000e+00> : vector<8xf32>
    %43 = vector.multi_reduction <add>, %40, %cst_18 [1] : vector<8x128xf32> to vector<8xf32>
    %44 = vector.shape_cast %43 : vector<8xf32> to vector<8x1xf32>
    %c0_19 = arith.constant 0 : index
    %c0_20 = arith.constant 0 : index
    %45 = vector.load %arg5[%c0_19, %c0_20] : memref<8x128xf32, #tpu.memory_space<vmem>>, vector<8x128xf32>
    tpu.vector_store %arg5[%c0_19, %c0_20], %5 {strides = array<i32>} : memref<8x128xf32, #tpu.memory_space<vmem>>, vector<8x128xf32>,
    %c0_21 = arith.constant 0 : index
    %c0_22 = arith.constant 0 : index
    %46 = vector.load %arg6[%c0_21, %c0_22] : memref<8x128xf32, #tpu.memory_space<vmem>>, vector<8x128xf32>
    tpu.vector_store %arg6[%c0_21, %c0_22], %23 {strides = array<i32>} : memref<8x128xf32, #tpu.memory_space<vmem>>, vector<8x128xf32>,
    %cst_23 = arith.constant 0.000000e+00 : f32
    %47 = vector.broadcast %cst_23 : f32 to vector<8x128xf32>
    %48 = arith.cmpf ogt, %5, %47 : vector<8x128xf32>
    %49 = arith.extui %48 : vector<8x128xi1> to vector<8x128xi32>
    %50 = arith.sitofp %49 : vector<8x128xi32> to vector<8x128xf32>
    %c0_24 = arith.constant 0 : index
    %c0_25 = arith.constant 0 : index
    %51 = vector.load %arg7[%c0_24, %c0_25] : memref<8x128xf32, #tpu.memory_space<vmem>>, vector<8x128xf32>
    tpu.vector_store %arg7[%c0_24, %c0_25], %50 {strides = array<i32>} : memref<8x128xf32, #tpu.memory_space<vmem>>, vector<8x128xf32>,
    %c0_26 = arith.constant 0 : index
    %c0_27 = arith.constant 0 : index
    %52 = vector.load %arg8[%c0_26, %c0_27] : memref<8x2xf32, #tpu.memory_space<vmem>>, vector<8x1xf32>
    tpu.vector_store %arg8[%c0_26, %c0_27], %42 {strides = array<i32>} : memref<8x2xf32, #tpu.memory_space<vmem>>, vector<8x1xf32>,
    %c0_28 = arith.constant 0 : index
    %c1 = arith.constant 1 : index
    %53 = vector.load %arg8[%c0_28, %c1] : memref<8x2xf32, #tpu.memory_space<vmem>>, vector<8x1xf32>
    tpu.vector_store %arg8[%c0_28, %c1], %44 {strides = array<i32>} : memref<8x2xf32, #tpu.memory_space<vmem>>, vector<8x1xf32>,
    return
  }
  func.func @transform_0(%arg0: i32) -> (i32, i32) {
    %c0_i32 = arith.constant 0 : i32
    %c0_i32_0 = arith.constant 0 : i32
    return %arg0, %c0_i32 : i32, i32
  }
  func.func @transform_1(%arg0: i32) -> (i32, i32) {
    %c0_i32 = arith.constant 0 : i32
    %c0_i32_0 = arith.constant 0 : i32
    %c0_i32_1 = arith.constant 0 : i32
    return %c0_i32, %c0_i32_0 : i32, i32
  }
  func.func @transform_2(%arg0: i32) -> (i32, i32) {
    %c0_i32 = arith.constant 0 : i32
    %c0_i32_0 = arith.constant 0 : i32
    %c0_i32_1 = arith.constant 0 : i32
    return %c0_i32, %c0_i32_0 : i32, i32
  }
  func.func @transform_3(%arg0: i32) -> (i32, i32) {
    %c0_i32 = arith.constant 0 : i32
    %c0_i32_0 = arith.constant 0 : i32
    return %arg0, %c0_i32 : i32, i32
  }
  func.func @transform_4(%arg0: i32) -> (i32, i32) {
    %c0_i32 = arith.constant 0 : i32
    %c0_i32_0 = arith.constant 0 : i32
    return %arg0, %c0_i32 : i32, i32
  }
  func.func @transform_5(%arg0: i32) -> (i32, i32) {
    %c0_i32 = arith.constant 0 : i32
    %c0_i32_0 = arith.constant 0 : i32
    return %arg0, %c0_i32 : i32, i32
  }
  func.func @transform_6(%arg0: i32) -> (i32, i32) {
    %c0_i32 = arith.constant 0 : i32
    %c0_i32_0 = arith.constant 0 : i32
    return %arg0, %c0_i32 : i32, i32
  }
  func.func @transform_7(%arg0: i32) -> (i32, i32) {
    %c0_i32 = arith.constant 0 : i32
    %c0_i32_0 = arith.constant 0 : i32
    return %arg0, %c0_i32 : i32, i32
  }
}

</mosaic_0001>

<bundles_post_ra>
// kernel: tpu_custom_call.1
= control target key start
LH: loop header
LB: loop body
LE: loop exit
PB: predicated region body
PF: predicated region fallthrough
CT: control target
= control target key end

     0   :  { %13 = vsyncpa [#allocation3], 0  ;;  %s519_s0 = inlined_call_operand.hbm [shape: f32[8,32], index: 0, kind: input, shape index: {}]   ;;  %s520_s1 = inlined_call_operand.hbm [shape: f32[32,128], index: 1, kind: input, shape index: {}]   ;;  %s521_s2 = inlined_call_operand.vmem [shape: f32[1,128], index: 2, kind: input, shape index: {}]   ;;  %s522_s3 = inlined_call_operand.vmem [shape: f32[8,128], index: 3, kind: input, shape index: {}]   ;;  %s523_s4 = inlined_call_operand.hbm [shape: f32[8,128], index: 4, kind: output, shape index: {0}]   ;;  %s524_s5 = inlined_call_operand.hbm [shape: f32[8,128], index: 5, kind: output, shape index: {1}]   ;;  %s525_s6 = inlined_call_operand.hbm [shape: f32[8,128], index: 6, kind: output, shape index: {2}]   ;;  %s526_s7 = inlined_call_operand.vmem [shape: f32[8,2], index: 7, kind: output, shape index: {3}]  }
   0x1   :  { %14 = vsyncpa [#allocation6], 0 }
   0x2   :  { %15 = vsyncpa [#allocation4], 0 }
   0x3   :  { %16 = vsyncpa [#allocation9], 0  ;;  %s390_s24 = smov [#allocation2]   ;;  %s391_s26 = smov [#allocation5]  }
   0x4   :  { %s23_s25 = sshll.u32 %s390_s24, 4  ;;  %s32_s27 = sshll.u32 %s391_s26, 4  ;;  %s24_s25 = int_to_ptr.vmem [resolvable:$true] %s23_s25  ;;  %s440_s27 = int_to_ptr.vmem [resolvable:$true] %s32_s27 }
   0x5   :  { %s272_s30 = scalar_lea.hbm %s519_s0, 128 }
   0x6   :  { %p273_p0 = scmp.ne.s32.totalorder %s519_s0, %s272_s30  ;;  %p276_p1 = scmp.lt.u32.totalorder %s272_s30, %s519_s0 }
   0x8   :  { %p278_p2 = pnand %p276_p1, %p273_p0 }
   0xa   :  { %281 = shalt.err (!%p278_p2)
}
   0xb   :  { %s282_s12 = scalar_lea.vmem %s24_s25, 128  ;;  %p287_p4 = scmp.lt.s32.totalorder %s24_s25, %s24_s25 }
   0xc   :  { %p283_p3 = scmp.ne.s32.totalorder %s24_s25, %s282_s12  ;;  %p288_p5 = scmp.lt.s32.totalorder %s282_s12, %s282_s12 }
   0xe   :  { %p289_p6 = por %p288_p5, %p287_p4 }
  0x10   :  { %p290_p7 = pnand %p289_p6, %p283_p3 }
  0x12   :  { %293 = shalt.err (!%p290_p7)
}
  0x13   :  { %26 = dma.hbm_to_vmem [thread:$0]  %s519_s0, 128, %s24_s25, [#allocation3]  }
  0x14   :  { %s294_s17 = scalar_lea.hbm %s520_s1, 512 }
  0x15   :  { %p295_p8 = scmp.ne.s32.totalorder %s520_s1, %s294_s17  ;;  %p298_p9 = scmp.lt.u32.totalorder %s294_s17, %s520_s1 }
  0x17   :  { %p300_p10 = pnand %p298_p9, %p295_p8 }
  0x19   :  { %303 = shalt.err (!%p300_p10)
}
  0x1a   :  { %s304_s22 = scalar_lea.vmem %s440_s27, 512  ;;  %p309_p12 = scmp.lt.s32.totalorder %s440_s27, %s440_s27 }
  0x1b   :  { %p305_p11 = scmp.ne.s32.totalorder %s440_s27, %s304_s22  ;;  %p310_p13 = scmp.lt.s32.totalorder %s304_s22, %s304_s22 }
  0x1d   :  { %p311_p0 = por %p310_p13, %p309_p12 }
  0x1f   :  { %p312_p1 = pnand %p311_p0, %p305_p11 }
  0x21   :  { %315 = shalt.err (!%p312_p1)
}
  0x22   :  { %s392_s0 = smov 128   ;;  %s393_s23 = smov 8  }
  0x23   :  { %38 = dma.hbm_to_vmem [thread:$0]  %s520_s1, 512, %s440_s27, [#allocation6], %s392_s0, %s392_s0, %s393_s23  }
  0x24   :  { %382 = dma.done.wait [#allocation3], 128  }
  0x25   :  { %383 = vsyncadd [#allocation3], 4294967168 }
  0x26   :  { %384 = dma.done.wait [#allocation6], 512  }
  0x27   :  { %385 = vsyncadd [#allocation6], 4294966784  ;;  %v394_v0 = vmov 0.0|0.0   ;;  %vm395_vm0 = vmmov 0   ;;  %v396_v1 = vmov 0.0   ;;  %v50_v2 = vld [vmem:[#allocation5] sm:$0xff]  ;;  %v165_v25 = vlaneseq }
  0x28   :  { %250 = vmatprep.subr.bf16.mxu0 %v394_v0  ;;  %247 = vmatprep.mubr.msk.f32.mxu0 %vm395_vm0, %v396_v1  ;;  %v51_v3 = vld [vmem:[#allocation5 + $0x8] sm:$0xff]  ;;  %v52_v4 = vld [vmem:[#allocation5 + $0x10] sm:$0xff]  ;;  %v53_v6 = vld [vmem:[#allocation5 + $0x18] sm:$0xff]  ;;  %vm61_vm1 = vcmask 261120   ;;  %s398_s29 = smov [#allocation7]  }
  0x29   :  { %v251_v5 = vpack.c.bf16 %v51_v3, %v50_v2  ;;  %v254_v7 = vpack.c.bf16 %v53_v6, %v52_v4  ;;  %v49_v8 = vld [vmem:[#allocation2] sm:$0xff]  ;;  %v166_v35 = vand.u32 127, %v165_v25  ;;  %s190_s30 = sshll.u32 %s398_s29, 4  ;;  %s191_s30 = int_to_ptr.vmem [resolvable:$true] %s190_s30 }
  0x2a   :  { %v231_v9 = vld [vmem:[%s521_s2] ss:$0 sm:$0xff] }
  0x2b   :  { %252 = vmatpush3.bf16.msra.mxu0 %v251_v5  ;;  %v157_v23 = vld [vmem:[%s522_s3] sm:$0xff]  ;;  %vm167_vm5 = vcmp.lt.s32.totalorder %v166_v35, 8  ;;  %s397_s3 = smov [#allocation8]  }
  0x2c   :  { %253 = vmatprep.subr.bf16.mxu0 %v394_v0  ;;  %v161_v29 = vsub.f32 1.0, %v157_v23  ;;  %s200_s28 = sshll.u32 %s397_s3, 4  ;;  %s201_s28 = int_to_ptr.vmem [resolvable:$true] %s200_s28 }
  0x2d   :  { %s316_s8 = scalar_lea.vmem %s201_s28, 128  ;;  %p321_p3 = scmp.lt.s32.totalorder %s201_s28, %s201_s28 }
  0x2e   :  { %p317_p2 = scmp.ne.s32.totalorder %s201_s28, %s316_s8  ;;  %p322_p4 = scmp.lt.s32.totalorder %s316_s8, %s316_s8 }
  0x2f   :  { %255 = vmatpush3.bf16.msra.mxu0 %v254_v7 }
  0x30   :  { %p323_p5 = por %p322_p4, %p321_p3 }
  0x32   :  { %248 = vmatmul.mubr.msk.f32.vlgmr.msra.gmra.mrb[0].mxu0 %vm61_vm1, %v49_v8  ;;  %p324_p6 = pnand %p323_p5, %p317_p2 }
 0x105   :  { %v131_v10 = vpop.f32.mrb[0].mxu0 }
 0x106   :  { %v132_v11 = vadd.f32 %v231_v9, %v131_v10  ;;  %v249_v12 = vpop.f32.mrb[1].mxu0 }
 0x108   :  { %v135_v13 = vand.u32 2147483647, %v132_v11  ;;  %174 = vst [vmem:[#allocation7] sm:$0xff] %v132_v11  ;;  %vm176_vm2 = vcmp.gt.f32.partialorder %v132_v11, 0.0  ;;  %v139_v21 = vsub.f32 0.0, %v132_v11  ;;  %vm154_vm4 = vcmp.ge.f32.partialorder %v132_v11, 0.0 }
 0x109   :  { %v233_v15 = vsel %vm176_vm2, 1.0, %v396_v1  ;;  %v162_v37 = vmul.f32 %v161_v29, %v132_v11 }
 0x10a   :  { %v136_v14 = vsub.f32 0.0, %v135_v13  ;;  %179 = vst [vmem:[#allocation10] sm:$0xff] %v233_v15  ;;  %v140_v30 = vmax.f32 %v139_v21, 0.0 }
 0x10c   :  { %v137_v16 = vmul.f32 1.442695, %v136_v14 }
 0x10e   :  { %266 = vpow2.f32 %v137_v16 }
 0x118   :  { %v267_v17 = vpop.eup %266 }
 0x119   :  { %v141_v18 = vadd.f32 1.0, %v267_v17  ;;  %v144_v19 = vmul.f32 -0.5, %v267_v17  ;;  %v147_v22 = vand.u32 2147483647, %v267_v17 }
 0x11b   :  { %268 = vlog2.f32 %v141_v18  ;;  %v145_v20 = vadd.f32 1.0, %v144_v19  ;;  %vm148_vm3 = vcmp.lt.f32.partialorder %v147_v22, 0.0004427343 }
 0x11c   :  { %270 = vrcp.f32 %v141_v18 }
 0x11d   :  { %v146_v28 = vmul.f32 %v267_v17, %v145_v20 }
 0x125   :  { %v269_v24 = vpop.eup %268 }
 0x126   :  { %v271_v26 = vpop.eup %270  ;;  %v143_v27 = vmul.f32 0.6931472, %v269_v24 }
 0x127   :  { %v155_v31 = vmul.f32 %v271_v26, %v267_v17 }
 0x128   :  { %v149_v32 = vsel %vm148_vm3, %v146_v28, %v143_v27 }
 0x129   :  { %v150_v33 = vadd.f32 %v149_v32, %v140_v30  ;;  %v156_v34 = vsel %vm154_vm4, %v271_v26, %v155_v31 }
 0x12a   :  { %v158_v36 = vsub.f32 1.0, %v156_v34  ;;  %175 = vst [vmem:[#allocation8] sm:$0xff] %v156_v34 }
 0x12b   :  { %v163_v39 = vadd.f32 %v162_v37, %v150_v33 }
 0x12c   :  { %v159_v38 = vmul.f32 %v158_v36, %v132_v11 }
 0x12d   :  { %v164_v42 = vsub.f32 0.0, %v163_v39 }
 0x12e   :  { %v160_v40 = vadd.f32 %v159_v38, %v150_v33 }
 0x12f   :  { %v169_v43 = vsel %vm167_vm5, %v164_v42, 0.0 }
 0x130   :  { %v168_v41 = vsel %vm167_vm5, %v160_v40, 0.0 }
 0x131   :  { %170 = vadd.xlane.f32.xlu0 %v168_v41 }
 0x135   :  { %172 = vadd.xlane.f32.xlu0 %v169_v43 }
 0x136   :  { %327 = shalt.err (!%p324_p6)
}
 0x137   :  { %s328_s11 = scalar_lea.hbm %s524_s5, 128 }
 0x138   :  { %p329_p7 = scmp.ne.s32.totalorder %s524_s5, %s328_s11  ;;  %p332_p8 = scmp.lt.u32.totalorder %s328_s11, %s524_s5 }
 0x13a   :  { %p334_p9 = pnand %p332_p8, %p329_p7 }
 0x13c   :  { %337 = shalt.err (!%p334_p9)
}
 0x13d   :  { %203 = dma.vmem_to_hbm [thread:$0]  %s201_s28, 128, %s524_s5, [#allocation9]  }
 0x13e   :  { %s338_s18 = scalar_lea.vmem %s191_s30, 128  ;;  %p343_p11 = scmp.lt.s32.totalorder %s191_s30, %s191_s30 }
 0x13f   :  { %p339_p10 = scmp.ne.s32.totalorder %s191_s30, %s338_s18  ;;  %p344_p12 = scmp.lt.s32.totalorder %s338_s18, %s338_s18 }
 0x141   :  { %p345_p13 = por %p344_p12, %p343_p11 }
 0x143   :  { %p346_p0 = pnand %p345_p13, %p339_p10 }
 0x145   :  { %349 = shalt.err (!%p346_p0)
}
 0x146   :  { %s350_s21 = scalar_lea.hbm %s523_s4, 128 }
 0x147   :  { %p351_p1 = scmp.ne.s32.totalorder %s523_s4, %s350_s21  ;;  %p354_p2 = scmp.lt.u32.totalorder %s350_s21, %s523_s4 }
 0x149   :  { %p356_p3 = pnand %p354_p2, %p351_p1 }
 0x14b   :  { %359 = shalt.err (!%p356_p3)
}
 0x14c   :  { %193 = dma.vmem_to_hbm [thread:$0]  %s191_s30, 128, %s523_s4, [#allocation4]  }
 0x14d   :  { %s399_s1 = smov [#allocation10]  }
 0x14e   :  { %s210_s26 = sshll.u32 %s399_s1, 4  ;;  %s211_s26 = int_to_ptr.vmem [resolvable:$true] %s210_s26 }
 0x14f   :  { %s360_s2 = scalar_lea.vmem %s211_s26, 128  ;;  %p365_p5 = scmp.lt.s32.totalorder %s211_s26, %s211_s26 }
 0x150   :  { %p361_p4 = scmp.ne.s32.totalorder %s211_s26, %s360_s2  ;;  %p366_p6 = scmp.lt.s32.totalorder %s360_s2, %s360_s2 }
 0x152   :  { %p367_p7 = por %p366_p6, %p365_p5 }
 0x154   :  { %p368_p8 = pnand %p367_p7, %p361_p4 }
 0x156   :  { %371 = shalt.err (!%p368_p8)
}
 0x157   :  { %s372_s28 = scalar_lea.hbm %s525_s6, 128 }
 0x158   :  { %p373_p9 = scmp.ne.s32.totalorder %s525_s6, %s372_s28  ;;  %p376_p10 = scmp.lt.u32.totalorder %s372_s28, %s525_s6 }
 0x15a   :  { %p378_p11 = pnand %p376_p10, %p373_p9 }
 0x15c   :  { %381 = shalt.err (!%p378_p11)
}
 0x15d   :  { %213 = dma.vmem_to_hbm [thread:$0]  %s211_s26, 128, %s525_s6, [#allocation9]   ;;  %vm180_vm6 = vcmask 7168   ;;  %vm182_vm7 = vcmask 15368  }
 0x1be   :  { %v171_v44 = vpop.xlane.xlu0 %170 }
 0x1bf   :  { %181 = vst.msk [vmem:[%s526_s7] sm:$0xff] %vm180_vm6, %v171_v44 }
 0x1c2   :  { %v173_v45 = vpop.xlane.xlu0 %172 }
 0x1c3   :  { %183 = vst.msk [vmem:[%s526_s7] sm:$0xff] %vm182_vm7, %v173_v45 }
 0x1c4   :  { %386 = dma.done.wait [#allocation4], 128  }
 0x1c5   :  { %387 = vsyncadd [#allocation4], 4294967168 }
 0x1c6   :  { %388 = dma.done.wait [#allocation9], 256  }
 0x1c7   :  { %389 = vsyncadd [#allocation9], 4294967040 }
 0x1c8   :  { %227 = vsyncpa [#allocation3], 1 }
 0x1c9   :  { %228 = vsyncpa [#allocation6], 1 }
 0x1ca   :  { %229 = vsyncpa [#allocation4], 1 }
 0x1cb   :  { %230 = vsyncpa [#allocation9], 1 }

</bundles_post_ra>
